<compile_context>
chip_gen: v7x
topology: tpu7x:2x2x1
jax: 0.10.0
libtpu: 0.0.40
codegen_flags: <defaults>
</compile_context>

<pallas_src>
import jax
import jax.numpy as jnp
from jax.experimental import pallas as pl
from jax.experimental.pallas import tpu as pltpu


def _hbm_memcpy_kernel(x_hbm_ref, o_hbm_ref, sem):
    # Whole-array HBM -> HBM DMA; no VMEM staging, no vector load/store slots used.
    cp = pltpu.make_async_copy(x_hbm_ref, o_hbm_ref, sem)
    cp.start()
    cp.wait()


def pooler(outputs: jax.Array) -> jax.Array:
    """Faithful Pallas-side equivalent of Pooler.forward(outputs) -> outputs.

    The forward is a pure pass-through, so the optimal implementation is no
    kernel at all (O(0) HBM traffic).  Use `pooler_copy` if a materialized
    duplicate buffer is explicitly required.
    """
    return outputs


@jax.jit
def pooler_copy(outputs: jax.Array) -> jax.Array:
    """Materialized identity copy via a single HBM->HBM DMA Pallas kernel."""
    if outputs.ndim == 0 or outputs.size == 0:
        # Nothing for a DMA engine to do; materialize trivially.
        return jnp.copy(outputs)

    return pl.pallas_call(
        _hbm_memcpy_kernel,
        out_shape=jax.ShapeDtypeStruct(outputs.shape, outputs.dtype),
        in_specs=[pl.BlockSpec(memory_space=pl.ANY)],
        out_specs=pl.BlockSpec(memory_space=pl.ANY),
        scratch_shapes=[pltpu.SemaphoreType.DMA(())],
    )(outputs)


if __name__ == "__main__":
    key = jax.random.PRNGKey(0)
    # Typical transformer last-hidden-state shape: (batch, seq, hidden)
    batch, seq, hidden = 2, 8, 32
    outputs = jax.random.normal(key, (batch, seq, hidden), dtype=jnp.float32)

    # Default path: identity, no kernel (matches Pooler.forward semantics exactly).
    ident = pooler(outputs)
    jax.block_until_ready(ident)
    assert ident.shape == outputs.shape
    assert ident.dtype == outputs.dtype
    assert bool(jnp.array_equal(ident, outputs)), "identity mismatch"

    # Explicit-copy path: Pallas HBM->HBM DMA kernel producing a fresh buffer.
    copied = pooler_copy(outputs)
    jax.block_until_ready(copied)
    assert copied.shape == outputs.shape
    assert copied.dtype == outputs.dtype
    assert bool(jnp.allclose(copied, outputs)), "copy mismatch"

    print("KERNEL_OK")
</pallas_src>

<mosaic_0001>
module attributes {stable_mosaic.version = 11 : i64} {
  func.func @_hbm_memcpy_kernel(%arg0: memref<2x8x32xf32, #tpu.memory_space<any>>, %arg1: memref<2x8x32xf32, #tpu.memory_space<any>>, %arg2: memref<!tpu.dma_semaphore, #tpu.memory_space<semaphore_mem>>) attributes {dimension_semantics = [], scalar_prefetch = 0 : i64, scratch_operands = 1 : i64, tpu.core_type = #tpu.core_type<tc>} {
    tpu.enqueue_dma source(%arg0 : memref<2x8x32xf32, #tpu.memory_space<any>>) target(%arg1 : memref<2x8x32xf32, #tpu.memory_space<any>>) target_semaphore(%arg2 : memref<!tpu.dma_semaphore, #tpu.memory_space<semaphore_mem>>)
    tpu.wait_dma2 semaphore(%arg2 : memref<!tpu.dma_semaphore, #tpu.memory_space<semaphore_mem>>) src(%arg0 : memref<2x8x32xf32, #tpu.memory_space<any>>) dst(%arg1 : memref<2x8x32xf32, #tpu.memory_space<any>>)
    return
  }
}

</mosaic_0001>

<bundles_post_ra>
// kernel: pooler_copy.1
= control target key start
LH: loop header
LB: loop body
LE: loop exit
PB: predicated region body
PF: predicated region fallthrough
CT: control target
= control target key end

     0   :  { %s35_s6 = smov [#allocation2]   ;;  %s36_s7 = smov [#allocation3]   ;;  %s54_s0 = inlined_call_operand.hbm [shape: f32[2,8,32], index: 0, kind: input, shape index: {}]   ;;  %s55_s1 = inlined_call_operand.hbm [shape: f32[2,8,32], index: 1, kind: output, shape index: {}]  }
   0x1   :  { %s37_s8 = smov 0  }
   0x2   :  { %18 = dma.general %s54_s0, 256, %s55_s1, %s35_s6, %s36_s7, [#allocation4], %s37_s8, 0  }
   0x3   :  { %33 = dma.done.wait [#allocation2], 256 }
   0x4   :  { %34 = vsyncadd [#allocation2], 4294967040 }
   0x5   :  { %23 = vsyncmov [#allocation2] }
   0x8   :  { %s24_s13 = vpop.sfrf %23 }
   0x9   :  { %p29_p0 = scmp.ne.s32.totalorder %s24_s13, 0 }
   0xb   :  { %28 = shalt.err (%p29_p0)  }

</bundles_post_ra>
